<compile_context>
chip_gen: v5e
topology: v5e:2x2
jax: 0.10.0
libtpu: 0.0.40
codegen_flags: <defaults>
</compile_context>

<pallas_src>
import functools

import jax
import jax.numpy as jnp
from jax.experimental import pallas as pl
from jax.experimental.pallas import tpu as pltpu

HIDDEN = 64      # matches the PyTorch module (nn.Linear(in, 64))
HEAD_PAD = 128   # lane-dense fused-head width (policy | value | zero padding)


def actor_critic_kernel(obs_ref,
                        w1_ref, b1_ref,
                        w2_ref, b2_ref,
                        wh_ref, bh_ref,
                        out_ref):
    # fc1 + ReLU
    z = jnp.dot(obs_ref[...], w1_ref[...], preferred_element_type=jnp.float32)
    z = jnp.maximum(z + b1_ref[...], 0.0)
    # fc2 + ReLU
    z = jnp.dot(z, w2_ref[...], preferred_element_type=jnp.float32)
    z = jnp.maximum(z + b2_ref[...], 0.0)
    # fused policy+value head, lane-dense (padded to HEAD_PAD lanes)
    out_ref[...] = (jnp.dot(z, wh_ref[...], preferred_element_type=jnp.float32)
                    + bh_ref[...]).astype(out_ref.dtype)


def actor_critic_forward(obs, params, *, out_dims, block_b=256):
    """obs: [B, in_dims] f32 -> (policy [B, out_dims] f32, value [B, 1] f32)."""
    B, in_dims = obs.shape

    # Batch tile: multiple of 8 sublanes, capped at block_b; pad B up to a
    # whole number of tiles (zero rows are sliced away at the end).
    tb = block_b if B >= block_b else max(8, ((B + 7) // 8) * 8)
    n_tiles = pl.cdiv(B, tb)
    b_pad = n_tiles * tb
    if b_pad != B:
        obs = jnp.pad(obs, ((0, b_pad - B), (0, 0)))

    w1, b1 = params["w1"], params["b1"]
    w2, b2 = params["w2"], params["b2"]
    wh, bh = params["wh"], params["bh"]

    # Advisory cost estimate for the XLA scheduler.
    flops = 2 * b_pad * (in_dims * HIDDEN + HIDDEN * HIDDEN + HIDDEN * HEAD_PAD)
    bytes_accessed = 4 * (b_pad * in_dims + b_pad * HEAD_PAD
                          + w1.size + b1.size + w2.size + b2.size
                          + wh.size + bh.size)
    cost = pl.CostEstimate(flops=flops, transcendentals=0,
                           bytes_accessed=bytes_accessed)

    resident = lambda shape: pl.BlockSpec(shape, lambda i: (0, 0))

    out = pl.pallas_call(
        actor_critic_kernel,
        out_shape=jax.ShapeDtypeStruct((b_pad, HEAD_PAD), jnp.float32),
        grid=(n_tiles,),
        in_specs=[
            pl.BlockSpec((tb, in_dims), lambda i: (i, 0)),   # streamed obs tile
            resident((in_dims, HIDDEN)),                     # w1 (resident)
            resident((1, HIDDEN)),                           # b1
            resident((HIDDEN, HIDDEN)),                      # w2
            resident((1, HIDDEN)),                           # b2
            resident((HIDDEN, HEAD_PAD)),                    # fused head weight
            resident((1, HEAD_PAD)),                         # fused head bias
        ],
        out_specs=pl.BlockSpec((tb, HEAD_PAD), lambda i: (i, 0)),
        compiler_params=pltpu.CompilerParams(
            dimension_semantics=("parallel",),       # 2 TCs on v7x; no-op elsewhere
            vmem_limit_bytes=32 * 1024 * 1024,       # sized for v7x (64 MiB phys)
        ),
        cost_estimate=cost,
    )(obs, w1, b1, w2, b2, wh, bh)

    policy = out[:B, :out_dims]
    value = out[:B, out_dims:out_dims + 1]
    return policy, value


def init_params(key, in_dims, out_dims, hidden=HIDDEN):
    """PyTorch-Linear-style U(-1/sqrt(fan_in), 1/sqrt(fan_in)) init.
    Weights stored [in, out]. Also packs the two heads into a single
    zero-padded [hidden, HEAD_PAD] weight/bias for the fused kernel."""
    ks = jax.random.split(key, 8)

    def lin(kw, kb, fan_in, fan_out):
        bound = 1.0 / jnp.sqrt(float(fan_in))
        w = jax.random.uniform(kw, (fan_in, fan_out), jnp.float32, -bound, bound)
        b = jax.random.uniform(kb, (1, fan_out), jnp.float32, -bound, bound)
        return w, b

    w1, b1 = lin(ks[0], ks[1], in_dims, hidden)
    w2, b2 = lin(ks[2], ks[3], hidden, hidden)
    wp, bp = lin(ks[4], ks[5], hidden, out_dims)
    wv, bv = lin(ks[6], ks[7], hidden, 1)

    # Fuse + lane-pad the heads once on the host (zeros in unused lanes).
    pad = HEAD_PAD - (out_dims + 1)
    wh = jnp.concatenate(
        [wp, wv, jnp.zeros((hidden, pad), jnp.float32)], axis=1)
    bh = jnp.concatenate(
        [bp, bv, jnp.zeros((1, pad), jnp.float32)], axis=1)

    return {"w1": w1, "b1": b1, "w2": w2, "b2": b2,
            "wh": wh, "bh": bh,
            # raw heads kept only for the pure-JAX reference check
            "wp": wp, "bp": bp, "wv": wv, "bv": bv}


def reference_forward(obs, p):
    z = jnp.maximum(obs @ p["w1"] + p["b1"], 0.0)
    z = jnp.maximum(z @ p["w2"] + p["b2"], 0.0)
    return z @ p["wp"] + p["bp"], z @ p["wv"] + p["bv"]


if __name__ == "__main__":
    key = jax.random.PRNGKey(0)
    k_param, k_obs = jax.random.split(key)

    in_dims, out_dims, batch = 16, 4, 8
    params = init_params(k_param, in_dims, out_dims)
    obs = jax.random.normal(k_obs, (batch, in_dims), jnp.float32)

    forward = jax.jit(functools.partial(actor_critic_forward, out_dims=out_dims))
    policy, value = forward(obs, params)
    jax.block_until_ready((policy, value))

    # sanity check against pure-JAX reference
    ref_policy, ref_value = reference_forward(obs, params)
    assert policy.shape == (batch, out_dims)
    assert value.shape == (batch, 1)
    assert jnp.allclose(policy, ref_policy, atol=1e-5, rtol=1e-5)
    assert jnp.allclose(value, ref_value, atol=1e-5, rtol=1e-5)

    print("KERNEL_OK")
</pallas_src>

<mosaic_0001>
module attributes {stable_mosaic.version = 11 : i64} {
  func.func @actor_critic_kernel(%arg0: i32, %arg1: memref<8x16xf32, #tpu.memory_space<vmem>>, %arg2: memref<16x64xf32, #tpu.memory_space<vmem>>, %arg3: memref<1x64xf32, #tpu.memory_space<vmem>>, %arg4: memref<64x64xf32, #tpu.memory_space<vmem>>, %arg5: memref<1x64xf32, #tpu.memory_space<vmem>>, %arg6: memref<64x128xf32, #tpu.memory_space<vmem>>, %arg7: memref<1x128xf32, #tpu.memory_space<vmem>>, %arg8: memref<8x128xf32, #tpu.memory_space<vmem>>) attributes {dimension_semantics = [#tpu.dimension_semantics<parallel>], iteration_bounds = array<i64: 1>, scalar_prefetch = 0 : i64, scratch_operands = 0 : i64, tpu.core_type = #tpu.core_type<tc>, window_params = [{transform_indices = @transform_0, window_bounds = array<i64: 8, 16>}, {pipeline_mode = #tpu.pipeline_mode<synchronous>, transform_indices = @transform_1, window_bounds = array<i64: 16, 64>}, {pipeline_mode = #tpu.pipeline_mode<synchronous>, transform_indices = @transform_2, window_bounds = array<i64: 1, 64>}, {pipeline_mode = #tpu.pipeline_mode<synchronous>, transform_indices = @transform_3, window_bounds = array<i64: 64, 64>}, {pipeline_mode = #tpu.pipeline_mode<synchronous>, transform_indices = @transform_4, window_bounds = array<i64: 1, 64>}, {pipeline_mode = #tpu.pipeline_mode<synchronous>, transform_indices = @transform_5, window_bounds = array<i64: 64, 128>}, {pipeline_mode = #tpu.pipeline_mode<synchronous>, transform_indices = @transform_6, window_bounds = array<i64: 1, 128>}, {transform_indices = @transform_7, window_bounds = array<i64: 8, 128>}]} {
    %c0 = arith.constant 0 : index
    %c0_0 = arith.constant 0 : index
    %0 = vector.load %arg1[%c0, %c0_0] : memref<8x16xf32, #tpu.memory_space<vmem>>, vector<8x16xf32>
    %c0_1 = arith.constant 0 : index
    %c0_2 = arith.constant 0 : index
    %1 = vector.load %arg2[%c0_1, %c0_2] : memref<16x64xf32, #tpu.memory_space<vmem>>, vector<16x64xf32>
    %cst = arith.constant dense<0.000000e+00> : vector<8x64xf32>
    %2 = tpu.matmul %0, %1, %cst {dimension_numbers = #tpu.dot_dimension_numbers<[1], [0], [0], [1], [0, 0, 1, 1], [], []>} : vector<8x16xf32>, vector<16x64xf32>, vector<8x64xf32> -> vector<8x64xf32>
    %c0_3 = arith.constant 0 : index
    %c0_4 = arith.constant 0 : index
    %3 = vector.load %arg3[%c0_3, %c0_4] : memref<1x64xf32, #tpu.memory_space<vmem>>, vector<1x64xf32>
    %4 = vector.broadcast %3 : vector<1x64xf32> to vector<8x64xf32>
    %5 = arith.addf %2, %4 : vector<8x64xf32>
    %cst_5 = arith.constant 0.000000e+00 : f32
    %6 = vector.broadcast %cst_5 : f32 to vector<8x64xf32>
    %7 = arith.maximumf %5, %6 : vector<8x64xf32>
    %c0_6 = arith.constant 0 : index
    %c0_7 = arith.constant 0 : index
    %8 = vector.load %arg4[%c0_6, %c0_7] : memref<64x64xf32, #tpu.memory_space<vmem>>, vector<64x64xf32>
    %cst_8 = arith.constant dense<0.000000e+00> : vector<8x64xf32>
    %9 = tpu.matmul %7, %8, %cst_8 {dimension_numbers = #tpu.dot_dimension_numbers<[1], [0], [0], [1], [0, 0, 1, 1], [], []>} : vector<8x64xf32>, vector<64x64xf32>, vector<8x64xf32> -> vector<8x64xf32>
    %c0_9 = arith.constant 0 : index
    %c0_10 = arith.constant 0 : index
    %10 = vector.load %arg5[%c0_9, %c0_10] : memref<1x64xf32, #tpu.memory_space<vmem>>, vector<1x64xf32>
    %11 = vector.broadcast %10 : vector<1x64xf32> to vector<8x64xf32>
    %12 = arith.addf %9, %11 : vector<8x64xf32>
    %cst_11 = arith.constant 0.000000e+00 : f32
    %13 = vector.broadcast %cst_11 : f32 to vector<8x64xf32>
    %14 = arith.maximumf %12, %13 : vector<8x64xf32>
    %c0_12 = arith.constant 0 : index
    %c0_13 = arith.constant 0 : index
    %15 = vector.load %arg6[%c0_12, %c0_13] : memref<64x128xf32, #tpu.memory_space<vmem>>, vector<64x128xf32>
    %cst_14 = arith.constant dense<0.000000e+00> : vector<8x128xf32>
    %16 = tpu.matmul %14, %15, %cst_14 {dimension_numbers = #tpu.dot_dimension_numbers<[1], [0], [0], [1], [0, 0, 1, 1], [], []>} : vector<8x64xf32>, vector<64x128xf32>, vector<8x128xf32> -> vector<8x128xf32>
    %c0_15 = arith.constant 0 : index
    %c0_16 = arith.constant 0 : index
    %17 = vector.load %arg7[%c0_15, %c0_16] : memref<1x128xf32, #tpu.memory_space<vmem>>, vector<1x128xf32>
    %18 = vector.broadcast %17 : vector<1x128xf32> to vector<8x128xf32>
    %19 = arith.addf %16, %18 : vector<8x128xf32>
    %c0_17 = arith.constant 0 : index
    %c0_18 = arith.constant 0 : index
    %20 = vector.load %arg8[%c0_17, %c0_18] : memref<8x128xf32, #tpu.memory_space<vmem>>, vector<8x128xf32>
    tpu.vector_store %arg8[%c0_17, %c0_18], %19 {strides = array<i32>} : memref<8x128xf32, #tpu.memory_space<vmem>>, vector<8x128xf32>,
    return
  }
  func.func @transform_0(%arg0: i32) -> (i32, i32) {
    %c0_i32 = arith.constant 0 : i32
    %c0_i32_0 = arith.constant 0 : i32
    return %arg0, %c0_i32 : i32, i32
  }
  func.func @transform_1(%arg0: i32) -> (i32, i32) {
    %c0_i32 = arith.constant 0 : i32
    %c0_i32_0 = arith.constant 0 : i32
    %c0_i32_1 = arith.constant 0 : i32
    return %c0_i32, %c0_i32_0 : i32, i32
  }
  func.func @transform_2(%arg0: i32) -> (i32, i32) {
    %c0_i32 = arith.constant 0 : i32
    %c0_i32_0 = arith.constant 0 : i32
    %c0_i32_1 = arith.constant 0 : i32
    return %c0_i32, %c0_i32_0 : i32, i32
  }
  func.func @transform_3(%arg0: i32) -> (i32, i32) {
    %c0_i32 = arith.constant 0 : i32
    %c0_i32_0 = arith.constant 0 : i32
    %c0_i32_1 = arith.constant 0 : i32
    return %c0_i32, %c0_i32_0 : i32, i32
  }
  func.func @transform_4(%arg0: i32) -> (i32, i32) {
    %c0_i32 = arith.constant 0 : i32
    %c0_i32_0 = arith.constant 0 : i32
    %c0_i32_1 = arith.constant 0 : i32
    return %c0_i32, %c0_i32_0 : i32, i32
  }
  func.func @transform_5(%arg0: i32) -> (i32, i32) {
    %c0_i32 = arith.constant 0 : i32
    %c0_i32_0 = arith.constant 0 : i32
    %c0_i32_1 = arith.constant 0 : i32
    return %c0_i32, %c0_i32_0 : i32, i32
  }
  func.func @transform_6(%arg0: i32) -> (i32, i32) {
    %c0_i32 = arith.constant 0 : i32
    %c0_i32_0 = arith.constant 0 : i32
    %c0_i32_1 = arith.constant 0 : i32
    return %c0_i32, %c0_i32_0 : i32, i32
  }
  func.func @transform_7(%arg0: i32) -> (i32, i32) {
    %c0_i32 = arith.constant 0 : i32
    %c0_i32_0 = arith.constant 0 : i32
    return %arg0, %c0_i32 : i32, i32
  }
}

</mosaic_0001>

<bundles_post_ra>
// kernel: actor_critic_forward.1
= control target key start
LH: loop header
LB: loop body
LE: loop exit
PB: predicated region body
PF: predicated region fallthrough
CT: control target
= control target key end

     0   :  { %12 = vsyncpa [#allocation3], 0  ;;  %s422_s0 = inlined_call_operand.hbm [shape: f32[8,16], index: 0, kind: input, shape index: {}]   ;;  %s423_s1 = inlined_call_operand.hbm [shape: f32[16,64], index: 1, kind: input, shape index: {}]   ;;  %s424_s2 = inlined_call_operand.vmem [shape: f32[1,64], index: 2, kind: input, shape index: {}]   ;;  %s425_s3 = inlined_call_operand.hbm [shape: f32[64,64], index: 3, kind: input, shape index: {}]   ;;  %s426_s4 = inlined_call_operand.vmem [shape: f32[1,64], index: 4, kind: input, shape index: {}]   ;;  %s427_s5 = inlined_call_operand.hbm [shape: f32[64,128], index: 5, kind: input, shape index: {}]   ;;  %s428_s6 = inlined_call_operand.hbm [shape: f32[1,128], index: 6, kind: input, shape index: {}]   ;;  %s429_s7 = inlined_call_operand.vmem [shape: f32[8,128], index: 7, kind: output, shape index: {}]  }
   0x1   :  { %13 = vsyncpa [#allocation5], 0  ;;  %s30_s26 = sshll.u32 %s423_s1, 4  ;;  %s31_s26 = int_to_ptr.hbm [resolvable:$true] %s30_s26 }
   0x2   :  { %14 = vsyncpa [#allocation8], 0  ;;  %s351_s27 = smov [#allocation4]   ;;  %s60_s8 = sshll.u32 %s427_s5, 4  ;;  %s61_s8 = int_to_ptr.hbm [resolvable:$true] %s60_s8 }
   0x3   :  { %s32_s28 = sshll.u32 %s351_s27, 4  ;;  %s352_s9 = smov 128   ;;  %s33_s28 = int_to_ptr.vmem [resolvable:$true] %s32_s28 }
   0x4   :  { %s353_s10 = smov 8   ;;  %s354_s11 = smov [#allocation7]  }
   0x5   :  { %38 = dma.hbm_to_vmem [thread:$0]  %s31_s26, 256, %s33_s28, [#allocation5], %s352_s9, %s352_s9, %s353_s10  }
   0x6   :  { %s62_s12 = sshll.u32 %s354_s11, 4  ;;  %s20_s15 = sshll.u32 %s422_s0, 4  ;;  %s63_s12 = int_to_ptr.vmem [resolvable:$true] %s62_s12  ;;  %s21_s15 = int_to_ptr.hbm [resolvable:$true] %s20_s15 }
   0x7   :  { %68 = dma.hbm_to_vmem [thread:$0]  %s61_s8, 1024, %s63_s12, [#allocation8], %s352_s9, %s352_s9, %s353_s10  }
   0x8   :  { %s45_s17 = sshll.u32 %s425_s3, 4  ;;  %s355_s18 = smov [#allocation2]   ;;  %s46_s17 = int_to_ptr.hbm [resolvable:$true] %s45_s17 }
   0x9   :  { %s22_s19 = sshll.u32 %s355_s18, 4  ;;  %s356_s5 = smov [#allocation6]   ;;  %s23_s19 = int_to_ptr.vmem [resolvable:$true] %s22_s19 }
   0xa   :  { %25 = dma.hbm_to_vmem [thread:$0]  %s21_s15, 128, %s23_s19, [#allocation3]  }
   0xb   :  { %s47_s20 = sshll.u32 %s356_s5, 4  ;;  %s74_s23 = sshll.u32 %s428_s6, 4  ;;  %s48_s20 = int_to_ptr.vmem [resolvable:$true] %s47_s20  ;;  %s75_s23 = int_to_ptr.hbm [resolvable:$true] %s74_s23 }
   0xc   :  { %53 = dma.hbm_to_vmem [thread:$0]  %s46_s17, 1024, %s48_s20, [#allocation5], %s352_s9, %s352_s9, %s353_s10  }
   0xd   :  { %s357_s0 = smov [#allocation9]  }
   0xe   :  { %s76_s24 = sshll.u32 %s357_s0, 4  ;;  %s77_s24 = int_to_ptr.vmem [resolvable:$true] %s76_s24 }
   0xf   :  { %79 = dma.hbm_to_vmem [thread:$0]  %s75_s23, 16, %s77_s24, [#allocation8]  }
  0x10   :  { %345 = dma.done.wait [#allocation3], 128  }
  0x11   :  { %346 = vsyncadd [#allocation3], 4294967168 }
  0x12   :  { %347 = dma.done.wait [#allocation5], 1280  }
  0x13   :  { %348 = vsyncadd [#allocation5], 4294966016 }
  0x14   :  { %349 = dma.done.wait [#allocation8], 1040  }
  0x15   :  { %350 = vsyncadd [#allocation8], 4294966256  ;;  %v102_v0 = vld [vmem:[#allocation4 + $0x8] sm:$0xff]  ;;  %v101_v1 = vld [vmem:[#allocation4] sm:$0xff]  ;;  %vm107_vm0 = vcmask 130048   ;;  %vm144_vm1 = vcmask 523264  }
  0x16   :  { %125 = vmatpush.msra.mxu0 %v102_v0  ;;  %v100_v2 = vld [vmem:[#allocation2] sm:$0xff]  ;;  %v139_v3 = vld [vmem:[#allocation6 + $0x38] sm:$0xff]  ;;  %v138_v4 = vld [vmem:[#allocation6 + $0x30] sm:$0xff] }
  0x17   :  { %156 = vmatpush.msra.mxu1 %v139_v3  ;;  %v137_v5 = vld [vmem:[#allocation6 + $0x28] sm:$0xff]  ;;  %v136_v6 = vld [vmem:[#allocation6 + $0x20] sm:$0xff]  ;;  %v135_v7 = vld [vmem:[#allocation6 + $0x18] sm:$0xff] }
  0x18   :  { %126 = vmatpush.msra.mxu0 %v101_v1  ;;  %v134_v8 = vld [vmem:[#allocation6 + $0x10] sm:$0xff]  ;;  %v133_v9 = vld [vmem:[#allocation6 + $0x8] sm:$0xff]  ;;  %v132_v10 = vld [vmem:[#allocation6] sm:$0xff] }
  0x19   :  { %212 = vmatmul.msk.f32.vlgmr.msra.gmra.mxu0 %vm107_vm0, %v100_v2  ;;  %157 = vmatpush.msra.mxu1 %v138_v4  ;;  %v176_v11 = vld [vmem:[#allocation7 + $0x38] sm:$0xff]  ;;  %v175_v12 = vld [vmem:[#allocation7 + $0x30] sm:$0xff]  ;;  %v174_v13 = vld [vmem:[#allocation7 + $0x28] sm:$0xff] }
  0x1a   :  { %192 = vmatpush.msra.mxu2 %v176_v11  ;;  %v173_v14 = vld [vmem:[#allocation7 + $0x20] sm:$0xff]  ;;  %v172_v15 = vld [vmem:[#allocation7 + $0x18] sm:$0xff]  ;;  %v222_v16 = vld [vmem:[%s424_s2] ss:$0 sm:$0xff] }
  0x1b   :  { %158 = vmatpush.msra.mxu1 %v137_v5  ;;  %v171_v20 = vld [vmem:[#allocation7 + $0x10] sm:$0xff]  ;;  %v170_v21 = vld [vmem:[#allocation7 + $0x8] sm:$0xff]  ;;  %v169_v22 = vld [vmem:[#allocation7] sm:$0xff] }
  0x1c   :  { %193 = vmatpush.msra.mxu2 %v175_v12  ;;  %v223_v23 = vld [vmem:[%s426_s4] ss:$0 sm:$0xff]  ;;  %v224_v27 = vld [vmem:[#allocation9] ss:$0 sm:$0xff] }
  0x1d   :  { %159 = vmatpush.msra.mxu1 %v136_v6 }
  0x1e   :  { %194 = vmatpush.msra.mxu2 %v174_v13 }
  0x1f   :  { %160 = vmatpush.msra.mxu1 %v135_v7 }
  0x20   :  { %195 = vmatpush.msra.mxu2 %v173_v14 }
  0x21   :  { %161 = vmatpush.msra.mxu1 %v134_v8 }
  0x22   :  { %196 = vmatpush.msra.mxu2 %v172_v15 }
  0x23   :  { %162 = vmatpush.msra.mxu1 %v133_v9 }
  0x24   :  { %197 = vmatpush.msra.mxu2 %v171_v20 }
  0x25   :  { %163 = vmatpush.msra.mxu1 %v132_v10 }
  0x26   :  { %198 = vmatpush.msra.mxu2 %v170_v21 }
  0x28   :  { %199 = vmatpush.msra.mxu2 %v169_v22 }
  0x96   :  { %v128_v17 = vpop.f32.mrf.mxu0 }
  0x97   :  { %v129_v18 = vadd.f32 %v222_v16, %v128_v17 }
  0x99   :  { %v131_v19 = vmax.f32 %v129_v18, 0.0 }
  0x9b   :  { %213 = vmatmul.msk.f32.vlgmr.msra.gmra.mxu1 %vm144_vm1, %v131_v19 }
 0x118   :  { %v165_v24 = vpop.f32.mrf.mxu1 }
 0x119   :  { %v166_v25 = vadd.f32 %v223_v23, %v165_v24 }
 0x11b   :  { %v168_v26 = vmax.f32 %v166_v25, 0.0 }
 0x11d   :  { %214 = vmatmul.msk.f32.vlgmr.msra.gmra.mxu2 %vm144_vm1, %v168_v26 }
 0x1a0   :  { %v201_v28 = vpop.f32.mrf.mxu2 }
 0x1a1   :  { %v202_v29 = vadd.f32 %v224_v27, %v201_v28 }
 0x1a3   :  { %204 = vst [vmem:[%s429_s7] sm:$0xff] %v202_v29 }
 0x1a4   :  { %209 = vsyncpa [#allocation3], 1 }
 0x1a5   :  { %210 = vsyncpa [#allocation5], 1 }
 0x1a6   :  { %211 = vsyncpa [#allocation8], 1 }

</bundles_post_ra>
